<compile_context>
chip_gen: v7x
topology: tpu7x:2x2x1
jax: 0.10.0
libtpu: 0.0.40
codegen_flags: <defaults>
</compile_context>

<pallas_src>
import functools

import jax
import jax.numpy as jnp
from jax.experimental import pallas as pl
from jax.experimental.pallas import tpu as pltpu

LANE = 128


def _round_up(v, m):
    return (v + m - 1) // m * m


def _pad2(x, rows, cols):
    r, c = x.shape
    return jnp.pad(x, ((0, rows - r), (0, cols - c)))


def gcn_layer_kernel(a_ref, x_ref, w_ref, b_ref, out_ref, acc_ref, *, apply_relu):
    """One GCNConv layer: out_tile = (sum_k A[i,k] @ X[k]) @ W + b  (opt. ReLU)."""
    k = pl.program_id(1)

    @pl.when(k == 0)
    def _():
        acc_ref[...] = jnp.zeros_like(acc_ref)

    # bf16 x bf16 -> f32 accumulation on the MXU (the dominant N^2 term).
    acc_ref[...] += jnp.dot(
        a_ref[...], x_ref[...], preferred_element_type=jnp.float32
    )

    @pl.when(k == pl.num_programs(1) - 1)
    def _():
        y = (
            jnp.dot(acc_ref[...], w_ref[...], preferred_element_type=jnp.float32)
            + b_ref[...]
        )
        if apply_relu:
            y = jnp.maximum(y, 0.0)
        out_ref[...] = y.astype(out_ref.dtype)


def _gcn_layer(a_hat, x, w, b, *, apply_relu, out_dtype, tm=128, tk=128):
    """a_hat: [Np, Np] bf16, x: [Np, Fin_p] bf16, w: [Fin_p, Fout_p] f32,
    b: [1, Fout_p] f32.  All dims already padded/tile-aligned."""
    n_p = a_hat.shape[0]
    f_in = x.shape[1]
    f_out = w.shape[1]
    grid = (n_p // tm, n_p // tk)

    kernel = functools.partial(gcn_layer_kernel, apply_relu=apply_relu)

    return pl.pallas_call(
        kernel,
        out_shape=jax.ShapeDtypeStruct((n_p, f_out), out_dtype),
        grid_spec=pltpu.PrefetchScalarGridSpec(
            num_scalar_prefetch=0,
            grid=grid,
            in_specs=[
                # A_hat tile: streamed / double-buffered along the k axis.
                pl.BlockSpec((tm, tk), lambda i, k: (i, k)),
                # Node-feature tile for the current k block.
                pl.BlockSpec((tk, f_in), lambda i, k: (k, 0)),
                # Weights / bias stay resident across the whole grid.
                pl.BlockSpec((f_in, f_out), lambda i, k: (0, 0)),
                pl.BlockSpec((1, f_out), lambda i, k: (0, 0)),
            ],
            out_specs=pl.BlockSpec((tm, f_out), lambda i, k: (i, 0)),
            scratch_shapes=[pltpu.VMEM((tm, f_in), jnp.float32)],
        ),
        compiler_params=pltpu.CompilerParams(
            dimension_semantics=("parallel", "arbitrary"),
            vmem_limit_bytes=32 * 1024 * 1024,  # fits every generation (v7x: 64 MiB phys)
        ),
    )(a_hat, x, w, b)


def gcn_forward(a_hat, x, w1, b1, w2, b2, *, tm=128, tk=128):
    """Two-layer GCN forward.  a_hat: [N, N] f32, x: [N, F_in] f32."""
    n = x.shape[0]
    out_dim = w2.shape[1]

    # Lane-pad feature dims and tile-pad the node dim.
    f_in_p = _round_up(x.shape[1], LANE)
    hid_p = _round_up(w1.shape[1], LANE)
    out_p = _round_up(out_dim, LANE)
    n_p = _round_up(n, max(tm, tk))

    a_p = _pad2(a_hat, n_p, n_p).astype(jnp.bfloat16)
    x_p = _pad2(x, n_p, f_in_p).astype(jnp.bfloat16)
    w1_p = _pad2(w1, f_in_p, hid_p).astype(jnp.float32)
    b1_p = _pad2(b1, 1, hid_p).astype(jnp.float32)
    w2_p = _pad2(w2, hid_p, out_p).astype(jnp.float32)
    b2_p = _pad2(b2, 1, out_p).astype(jnp.float32)

    # Layer 1 (+ReLU): store H in bf16 (it only feeds the next bf16 MXU pass).
    h = _gcn_layer(
        a_p, x_p, w1_p, b1_p, apply_relu=True, out_dtype=jnp.bfloat16, tm=tm, tk=tk
    )
    # Layer 2: final output in f32.
    y = _gcn_layer(
        a_p, h, w2_p, b2_p, apply_relu=False, out_dtype=jnp.float32, tm=tm, tk=tk
    )
    return y[:n, :out_dim]


def normalized_adjacency(edge_index, num_nodes):
    """Dense D^{-1/2}(A+I)D^{-1/2} from edge_index [2, E] (src, dst)."""
    src, dst = edge_index
    adj = jnp.zeros((num_nodes, num_nodes), jnp.float32)
    # message flows src -> dst: A_hat[dst, src]
    adj = adj.at[dst, src].add(1.0)
    adj = adj + jnp.eye(num_nodes, dtype=jnp.float32)  # self-loops
    deg = adj.sum(axis=1)
    d_inv_sqrt = jnp.where(deg > 0, 1.0 / jnp.sqrt(deg), 0.0)
    return d_inv_sqrt[:, None] * adj * d_inv_sqrt[None, :]


if __name__ == "__main__":
    # Small but non-trivial: N pads to 256 -> a 2x2 grid exercises the pipeline.
    num_nodes = 200
    input_dim = 8
    hidden_dim = 32
    output_dim = 8

    key = jax.random.PRNGKey(0)
    k_x, k_w1, k_w2 = jax.random.split(key, 3)

    # Node features
    x = jax.random.normal(k_x, (num_nodes, input_dim), jnp.float32)

    # Ring graph (bidirectional edges), edge_index shape [2, E]
    idx = jnp.arange(num_nodes)
    src = jnp.concatenate([idx, (idx + 1) % num_nodes])
    dst = jnp.concatenate([(idx + 1) % num_nodes, idx])
    edge_index = jnp.stack([src, dst], axis=0)

    # Deterministic parameter init (glorot-ish normals, zero bias)
    w1 = jax.random.normal(k_w1, (input_dim, hidden_dim), jnp.float32) * (
        1.0 / jnp.sqrt(input_dim)
    )
    b1 = jnp.zeros((1, hidden_dim), jnp.float32)
    w2 = jax.random.normal(k_w2, (hidden_dim, output_dim), jnp.float32) * (
        1.0 / jnp.sqrt(hidden_dim)
    )
    b2 = jnp.zeros((1, output_dim), jnp.float32)

    a_hat = normalized_adjacency(edge_index, num_nodes)

    out = gcn_forward(a_hat, x, w1, b1, w2, b2)
    jax.block_until_ready(out)

    # Pure-JAX f32 reference (tolerance loosened for bf16 MXU inputs).
    ref_h = jnp.maximum(a_hat @ (x @ w1) + b1, 0.0)
    ref = a_hat @ (ref_h @ w2) + b2
    assert out.shape == (num_nodes, output_dim)
    assert jnp.allclose(out, ref, atol=3e-2, rtol=3e-2), float(
        jnp.max(jnp.abs(out - ref))
    )

    print("KERNEL_OK")
</pallas_src>

<mosaic_0001>
module attributes {stable_mosaic.version = 11 : i64} {
  func.func @gcn_layer_kernel(%arg0: i32, %arg1: i32, %arg2: memref<128x128xbf16, #tpu.memory_space<vmem>>, %arg3: memref<128x128xbf16, #tpu.memory_space<vmem>>, %arg4: memref<128x128xf32, #tpu.memory_space<vmem>>, %arg5: memref<1x128xf32, #tpu.memory_space<vmem>>, %arg6: memref<128x128xbf16, #tpu.memory_space<vmem>>, %arg7: memref<128x128xf32, #tpu.memory_space<vmem>>) attributes {dimension_semantics = [#tpu.dimension_semantics<parallel>, #tpu.dimension_semantics<arbitrary>], iteration_bounds = array<i64: 2, 2>, scalar_prefetch = 0 : i64, scratch_operands = 1 : i64, tpu.core_type = #tpu.core_type<tc>, window_params = [{transform_indices = @transform_0, window_bounds = array<i64: 128, 128>}, {transform_indices = @transform_1, window_bounds = array<i64: 128, 128>}, {pipeline_mode = #tpu.pipeline_mode<synchronous>, transform_indices = @transform_2, window_bounds = array<i64: 128, 128>}, {pipeline_mode = #tpu.pipeline_mode<synchronous>, transform_indices = @transform_3, window_bounds = array<i64: 1, 128>}, {transform_indices = @transform_4, window_bounds = array<i64: 128, 128>}]} {
    %c0_i32 = arith.constant 0 : i32
    %0 = arith.cmpi eq, %arg1, %c0_i32 : i32
    %1 = arith.extui %0 : i1 to i32
    %c0_i32_0 = arith.constant 0 : i32
    %2 = arith.cmpi ne, %1, %c0_i32_0 : i32
    scf.if %2 {
      %cst_9 = arith.constant 0.000000e+00 : f32
      %12 = vector.broadcast %cst_9 : f32 to vector<128x128xf32>
      %c0_10 = arith.constant 0 : index
      %c0_11 = arith.constant 0 : index
      %13 = vector.load %arg7[%c0_10, %c0_11] : memref<128x128xf32, #tpu.memory_space<vmem>>, vector<128x128xf32>
      tpu.vector_store %arg7[%c0_10, %c0_11], %12 {strides = array<i32>} : memref<128x128xf32, #tpu.memory_space<vmem>>, vector<128x128xf32>,
    } else {
    }
    %c0 = arith.constant 0 : index
    %c0_1 = arith.constant 0 : index
    %3 = vector.load %arg7[%c0, %c0_1] : memref<128x128xf32, #tpu.memory_space<vmem>>, vector<128x128xf32>
    %c0_2 = arith.constant 0 : index
    %c0_3 = arith.constant 0 : index
    %4 = vector.load %arg2[%c0_2, %c0_3] : memref<128x128xbf16, #tpu.memory_space<vmem>>, vector<128x128xbf16>
    %c0_4 = arith.constant 0 : index
    %c0_5 = arith.constant 0 : index
    %5 = vector.load %arg3[%c0_4, %c0_5] : memref<128x128xbf16, #tpu.memory_space<vmem>>, vector<128x128xbf16>
    %cst = arith.constant dense<0.000000e+00> : vector<128x128xf32>
    %6 = tpu.matmul %4, %5, %cst {dimension_numbers = #tpu.dot_dimension_numbers<[1], [0], [0], [1], [0, 0, 1, 1], [], []>} : vector<128x128xbf16>, vector<128x128xbf16>, vector<128x128xf32> -> vector<128x128xf32>
    %7 = arith.addf %3, %6 : vector<128x128xf32>
    %c0_6 = arith.constant 0 : index
    %c0_7 = arith.constant 0 : index
    %8 = vector.load %arg7[%c0_6, %c0_7] : memref<128x128xf32, #tpu.memory_space<vmem>>, vector<128x128xf32>
    tpu.vector_store %arg7[%c0_6, %c0_7], %7 {strides = array<i32>} : memref<128x128xf32, #tpu.memory_space<vmem>>, vector<128x128xf32>,
    %c1_i32 = arith.constant 1 : i32
    %9 = arith.cmpi eq, %arg1, %c1_i32 : i32
    %10 = arith.extui %9 : i1 to i32
    %c0_i32_8 = arith.constant 0 : i32
    %11 = arith.cmpi ne, %10, %c0_i32_8 : i32
    scf.if %11 {
      %c0_9 = arith.constant 0 : index
      %c0_10 = arith.constant 0 : index
      %12 = vector.load %arg7[%c0_9, %c0_10] : memref<128x128xf32, #tpu.memory_space<vmem>>, vector<128x128xf32>
      %c0_11 = arith.constant 0 : index
      %c0_12 = arith.constant 0 : index
      %13 = vector.load %arg4[%c0_11, %c0_12] : memref<128x128xf32, #tpu.memory_space<vmem>>, vector<128x128xf32>
      %cst_13 = arith.constant dense<0.000000e+00> : vector<128x128xf32>
      %14 = tpu.matmul %12, %13, %cst_13 {dimension_numbers = #tpu.dot_dimension_numbers<[1], [0], [0], [1], [0, 0, 1, 1], [], []>} : vector<128x128xf32>, vector<128x128xf32>, vector<128x128xf32> -> vector<128x128xf32>
      %c0_14 = arith.constant 0 : index
      %c0_15 = arith.constant 0 : index
      %15 = vector.load %arg5[%c0_14, %c0_15] : memref<1x128xf32, #tpu.memory_space<vmem>>, vector<1x128xf32>
      %16 = vector.broadcast %15 : vector<1x128xf32> to vector<128x128xf32>
      %17 = arith.addf %14, %16 : vector<128x128xf32>
      %cst_16 = arith.constant 0.000000e+00 : f32
      %18 = vector.broadcast %cst_16 : f32 to vector<128x128xf32>
      %19 = arith.maximumf %17, %18 : vector<128x128xf32>
      %20 = arith.truncf %19 : vector<128x128xf32> to vector<128x128xbf16>
      %c0_17 = arith.constant 0 : index
      %c0_18 = arith.constant 0 : index
      %21 = vector.load %arg6[%c0_17, %c0_18] : memref<128x128xbf16, #tpu.memory_space<vmem>>, vector<128x128xbf16>
      tpu.vector_store %arg6[%c0_17, %c0_18], %20 {strides = array<i32>} : memref<128x128xbf16, #tpu.memory_space<vmem>>, vector<128x128xbf16>,
    } else {
    }
    return
  }
  func.func @transform_0(%arg0: i32, %arg1: i32) -> (i32, i32) {
    %c0_i32 = arith.constant 0 : i32
    return %arg0, %arg1 : i32, i32
  }
  func.func @transform_1(%arg0: i32, %arg1: i32) -> (i32, i32) {
    %c0_i32 = arith.constant 0 : i32
    %c0_i32_0 = arith.constant 0 : i32
    return %arg1, %c0_i32 : i32, i32
  }
  func.func @transform_2(%arg0: i32, %arg1: i32) -> (i32, i32) {
    %c0_i32 = arith.constant 0 : i32
    %c0_i32_0 = arith.constant 0 : i32
    %c0_i32_1 = arith.constant 0 : i32
    return %c0_i32, %c0_i32_0 : i32, i32
  }
  func.func @transform_3(%arg0: i32, %arg1: i32) -> (i32, i32) {
    %c0_i32 = arith.constant 0 : i32
    %c0_i32_0 = arith.constant 0 : i32
    %c0_i32_1 = arith.constant 0 : i32
    return %c0_i32, %c0_i32_0 : i32, i32
  }
  func.func @transform_4(%arg0: i32, %arg1: i32) -> (i32, i32) {
    %c0_i32 = arith.constant 0 : i32
    %c0_i32_0 = arith.constant 0 : i32
    return %arg0, %c0_i32 : i32, i32
  }
}

</mosaic_0001>

<bundles_post_ra>
// kernel: tpu_custom_call.1
= control target key start
LH: loop header
LB: loop body
LE: loop exit
PB: predicated region body
PF: predicated region fallthrough
CT: control target
= control target key end

     0   :  { %s2180_s0 = inlined_call_operand.hbm [shape: bf16[256,256], index: 0, kind: input, shape index: {}]   ;;  %s2181_s1 = inlined_call_operand.hbm [shape: bf16[256,128], index: 1, kind: input, shape index: {}]   ;;  %s2182_s2 = inlined_call_operand.hbm [shape: f32[128,128], index: 2, kind: input, shape index: {}]   ;;  %s2183_s3 = inlined_call_operand.vmem [shape: f32[1,128], index: 3, kind: input, shape index: {}]   ;;  %s2184_s4 = inlined_call_operand.hbm [shape: bf16[256,128], index: 4, kind: output, shape index: {}]  }
   0x1   :  { %2205 = sst [smem:[#allocation23_spill]] %s2180_s0 }
   0x2   :  { %2206 = sst [smem:[#allocation24_spill]] %s2182_s2 }
   0x3   :  { %2207 = sst [smem:[#allocation25_spill]] %s2183_s3 }
   0x4   :  { %2208 = sst [smem:[#allocation26_spill]] %s2184_s4 }
   0x5   :  { %9 = vsyncpa [#allocation4], 0 }
   0x6   :  { %11 = vsyncpa [#allocation4 + $0x1], 0 }
   0x7   :  { %12 = vsyncpa [#allocation7], 0 }
   0x8   :  { %14 = vsyncpa [#allocation7 + $0x1], 0 }
   0x9   :  { %15 = vsyncpa [#allocation5], 0 }
   0xa   :  { %17 = vsyncpa [#allocation5 + $0x1], 0  ;;  %s1767_s15 = smov 0   ;;  %s1769_s16 = smov 0  }
   0xb   :  { %s1771_s17 = smov 0   ;;  %s1773_s18 = smov 0  }
   0xc   :  { %s1775_s19 = smov 0   ;;  %s1777_s20 = smov 0  }
   0xd   :  { %s1779_s21 = smov 0   ;;  %s1781_s22 = smov 0  }
   0xe   :  { %s1783_s23 = smov 0   ;;  %s1785_s24 = smov 0  }
   0xf   :  { %s1787_s25 = smov 0   ;;  %s1789_s26 = smov 0  }
  0x10   :  { %s1791_s27 = smov 0   ;;  %s1793_s28 = smov 0  }
  0x11 LB: > { %2209 = sst [smem:[#allocation14_spill]] %s1677_s15  ;;  %s1834_s29 = sadd.s32 4294967295, %s1729_s28   ;;  %s1729_s28 = sphi %s1793_s28, %s23_s28   ;;  %s1725_s27 = sphi %s1791_s27, %s2268_s27   ;;  %s1721_s26 = sphi %s1789_s26, %s2267_s26   ;;  %s1717_s25 = sphi %s1787_s25, %s2266_s25   ;;  %s1713_s24 = sphi %s1785_s24, %s2265_s24   ;;  %s1709_s23 = sphi %s1783_s23, %s2264_s23   ;;  %s1705_s22 = sphi %s1781_s22, %s2263_s22   ;;  %s1701_s21 = sphi %s1779_s21, %s2262_s21   ;;  %s1697_s20 = sphi %s1777_s20, %s2261_s20   ;;  %s1693_s19 = sphi %s1775_s19, %s2260_s19   ;;  %s1689_s18 = sphi %s1773_s18, %s2259_s18   ;;  %s1685_s17 = sphi %s1771_s17, %s2258_s17   ;;  %s1681_s16 = sphi %s1769_s16, %s2257_s16   ;;  %s1677_s15 = sphi %s1767_s15, %s2253_s15  }
  0x12   : > { %2210 = sst [smem:[#allocation15_spill]] %s1681_s16  ;;  %s1000_s30 = sadd.s32 4294967294, %s1729_s28  }
  0x13   : > { %2211 = sst [smem:[#allocation16_spill]] %s1713_s24  ;;  %p57_p0 = scmp.ne.s32.totalorder %s1705_s22, %s1701_s21 }
  0x14   : > { %2212 = sst [smem:[#allocation17_spill]] %s1717_s25  ;;  %p2187_p1 = scmp.eq.s32.totalorder %s1834_s29, 0 }
  0x15   : > { %2213 = sst [smem:[#allocation18_spill]] %s1834_s29  ;;  %p83_p2 = scmp.ne.s32.totalorder %s1693_s19, %s1689_s18 }
  0x16   : > { %p1843_p3 = por %p2187_p1, %p57_p0  ;;  %p148_p4 = scmp.ne.s32.totalorder %s1685_s17, %s1681_s16 }
  0x17   : > { %p1851_p5 = por %p83_p2, %p2187_p1  ;;  %p149_p6 = scmp.eq.s32.totalorder %s1834_s29, 3 }
  0x18   : > { %s2214_s6 = scalar_select %p1843_p3, 1, 0 }
  0x19   : > { %s2215_s7 = scalar_select %p1851_p5, 1, 0 }
  0x1a   : > { %p154_p7 = scmp.ne.s32.totalorder %s1681_s16, %s1677_s15  ;;  %p155_p8 = scmp.eq.s32.totalorder %s1000_s30, 3 }
  0x1b   : > { %2216 = sst [smem:[#allocation19_spill]] %s2215_s7  ;;  %p1858_p9 = por %p149_p6, %p148_p4 }
  0x1c   : > { %p1001_p10 = scmp.ge.s32.totalorder %s1729_s28, 1  ;;  %p1863_p11 = por %p155_p8, %p154_p7 }
  0x1d   : > { %s2217_s8 = scalar_select %p1858_p9, 1, 0 }
  0x1e   : > { %s2219_s9 = scalar_select %p1863_p11, 1, 0 }
  0x1f   : > { %2218 = sst [smem:[#allocation20_spill]] %s2217_s8  ;;  %p162_p12 = scmp.lt.s32.totalorder %s1729_s28, 5 }
  0x20   : > { %2220 = sst [smem:[#allocation21_spill]] %s2219_s9  ;;  %s1731_s11 = smov [#allocation8]  }
  0x21   : > { %p1868_p13 = pnand %p1001_p10, %p162_p12  ;;  %s174_s12 = sshll.u32 %s1731_s11, 4  ;;  %s175_s12 = int_to_ptr.vmem [resolvable:$true] %s174_s12 }
  0x22   : > { %s2223_s2 = sld [smem:[#allocation24_spill]] }
  0x23   : > { %s2221_s10 = scalar_select %p1868_p13, 1, 0 }
  0x24   : > { %p1332_p0 = pneg %p1868_p13 }
  0x26   : > { %p1876_p2 = pnand %p1332_p0, %p2187_p1 }
  0x28   : > { %s1487_s21 = scalar_lea.hbm %s2223_s2, 2048  ;;  %p1489_p6 = pneg %p1876_p2 }
  0x29   : > { %p1488_p4 = scmp.ne.s32.totalorder %s2223_s2, %s1487_s21  ;;  %p1494_p10 = scmp.lt.u32.totalorder %s1487_s21, %s2223_s2 }
  0x2b   : > { %p1490_p7 = pnand %p1489_p6, %p1488_p4 }
  0x2d   : > { %p1491_p8 = pneg %p1490_p7 }
  0x2f   : > { %p1496_p12 = pnand %p1494_p10, %p1491_p8 }
  0x31   : > { %1499 = shalt.err (!%p1496_p12)
}
  0x32   : > { %s1500_s15 = scalar_lea.vmem %s175_s12, 2048  ;;  %p1508_p9 = scmp.lt.s32.totalorder %s175_s12, %s175_s12 }
  0x33   : > { %p1501_p0 = scmp.ne.s32.totalorder %s175_s12, %s1500_s15  ;;  %p1509_p5 = scmp.lt.s32.totalorder %s1500_s15, %s1500_s15 }
  0x35   : > { %p1503_p1 = pnand %p1501_p0, %p1489_p6  ;;  %p1510_p3 = por %p1509_p5, %p1508_p9 }
  0x37   : > { %p1504_p11 = pneg %p1503_p1 }
  0x39   : > { %p1511_p13 = pnand %p1510_p3, %p1504_p11 }
  0x3b   : > { %1514 = shalt.err (!%p1511_p13)
}
  0x3c   : > { %s2192_s5 = smov 128   ;;  %s1733_s9 = smov 8  }
  0x3d   : > { %1335 = dma.hbm_to_vmem [thread:$0]  (!%p1876_p2), %s2223_s2, 2048, %s175_s12, [#allocation7], %s2192_s5, %s2192_s5, %s1733_s9  }
  0x3e   : > { %s32_s18 = sadd.s32 1, %s1721_s26  ;;  %s35_s21 = sadd.s32 1, %s1725_s27 }
  0x3f   : > { %p33_p1 = scmp.ge.s32.totalorder %s32_s18, 2  ;;  %s44_s30 = sadd.s32 1, %s1709_s23 }
  0x40   : > { %p51_p3 = scmp.ne.s32.totalorder %s1709_s23, %s1705_s22  ;;  %p2204_p5 = scmp.eq.s32.totalorder %s1729_s28, 0 }
  0x41   : > { %s2270_s18 = smov (%p33_p1, %s32_s18), 0  ;;  %s2272_s21 = smov (!%p33_p1, %s35_s21), %s1725_s27 }
  0x42   : > { %2224 = sst [smem:[#allocation22_spill]] %s2270_s18  ;;  %s1908_s13 = ssub.s32 %s1721_s26, %s2270_s18 }
  0x43   : > { %p37_p9 = scmp.ge.s32.totalorder %s2272_s21, 2  ;;  %p68_p11 = scmp.eq.s32.totalorder %s1908_s13, 0 }
  0x44   : > { %p1914_p13 = por %p2204_p5, %p51_p3  ;;  %p2203_p2 = scmp.lt.s32.totalorder %s1729_s28, 4 }
  0x45   : > { %s2274_s21 = smov (%p37_p9, %s2272_s21), 0  ;;  %s191_s11 = sand.u32 1, %s1709_s23  }
  0x46   : > { %s1056_s9 = sshll.u32 %s1725_s27, 5  ;;  %s39_s15 = ssub.s32 %s1725_s27, %s2274_s21 }
  0x47   : > { %s41_s14 = sor.u32 %s1908_s13, %s39_s15  ;;  %p136_p4 = scmp.eq.s32.totalorder %s39_s15, 0 }
  0x48   : > { %p42_p6 = scmp.eq.s32.totalorder %s41_s14, 0  ;;  %s1004_s5 = sshll.u32 %s191_s11, 6 }
  0x49   : > { %s2226_s2 = sadd.s32 1, %s1685_s17  ;;  %s201_s8 = sadd.s32 %s1721_s26, %s1056_s9 }
  0x4a   : > { %s1929_s18 = scalar_select %p136_p4, %s1685_s17, %s2226_s2  }
  0x4b   : > { %s1932_s4 = scalar_select %p42_p6, %s1709_s23, %s44_s30  }
  0x4c   : > { %s1007_s25 = sshll.u32 %s201_s8, 6  ;;  %s195_s3 = scalar_lea.vmem [#allocation3], %s1004_s5 }
  0x4d   : > { %s204_s24 = sshll.u32 %s195_s3, 4  ;;  %s2227_s0 = sld [smem:[#allocation23_spill]]  ;;  %s1940_s24 = int_to_ptr.vmem [resolvable:$true] %s204_s24 }
  0x4e   : > { %p1946_p7 = pnand %p2203_p2, %p1914_p13  ;;  %s1950_s3 = scalar_lea.sflag [#allocation4], %s191_s11 }
  0x50   : > { %p1517_p10 = pneg %p1946_p7 }
  0x53   : > { %s1938_s29 = scalar_lea.hbm %s2227_s0, %s1007_s25  ;;  %s1520_s7 = scalar_lea.hbm %s2227_s0, 4096 }
  0x54   : > { %s1515_s8 = scalar_lea.hbm %s1938_s29, 1024  ;;  %p1521_p1 = scmp.lt.u32.totalorder %s1938_s29, %s2227_s0 }
  0x55   : > { %p1516_p8 = scmp.ne.s32.totalorder %s1938_s29, %s1515_s8  ;;  %p1522_p3 = scmp.lt.u32.totalorder %s1520_s7, %s1515_s8 }
  0x56   : > { %p1524_p13 = scmp.lt.u32.totalorder %s1515_s8, %s1938_s29 }
  0x57   : > { %p1518_p12 = pnand %p1517_p10, %p1516_p8  ;;  %p1523_p9 = por %p1522_p3, %p1521_p1 }
  0x59   : > { %p1519_p0 = pneg %p1518_p12  ;;  %p1525_p4 = por %p1524_p13, %p1523_p9 }
  0x5b   : > { %p1526_p6 = pnand %p1525_p4, %p1519_p0 }
  0x5d   : > { %1529 = shalt.err (!%p1526_p6)
}
  0x5e   : > { %s1530_s12 = scalar_lea.vmem %s1940_s24, 1024  ;;  %s1734_s11 = smov [#allocation3]  }
  0x5f   : > { %p1531_p8 = scmp.ne.s32.totalorder %s1940_s24, %s1530_s12  ;;  %s1535_s9 = sshll.u32 %s1734_s11, 4  ;;  %s1536_s9 = int_to_ptr.vmem [resolvable:$false] %s1535_s9 }
  0x60   : > { %s1537_s15 = scalar_lea.vmem %s1536_s9, 2048  ;;  %p1538_p5 = scmp.lt.s32.totalorder %s1940_s24, %s1536_s9 }
  0x61   : > { %p1533_p12 = pnand %p1531_p8, %p1517_p10  ;;  %p1539_p1 = scmp.lt.s32.totalorder %s1537_s15, %s1530_s12 }
  0x63   : > { %p1534_p2 = pneg %p1533_p12  ;;  %p1540_p3 = por %p1539_p1, %p1538_p5 }
  0x65   : > { %p1541_p9 = pnand %p1540_p3, %p1534_p2 }
  0x67   : > { %1544 = shalt.err (!%p1541_p9)
}
  0x68   : > { %s1735_s14 = smov 64   ;;  %s1736_s8 = smov 4  }
  0x69   : > { %s2229_s16 = smov 128   ;;  %s70_s25 = sadd.s32 1, %s1697_s20 }
  0x6a   : > { %1339 = dma.hbm_to_vmem [thread:$0]  (!%p1946_p7), %s1938_s29, 1024, %s1940_s24, %s1950_s3, %s2229_s16, %s1735_s14, %s1736_s8  }
  0x6b   : > { %p77_p5 = scmp.ne.s32.totalorder %s1697_s20, %s1693_s19  ;;  %p2230_p2 = scmp.eq.s32.totalorder %s1729_s28, 0 }
  0x6c   : > { %s1987_s7 = scalar_select %p68_p11, %s1697_s20, %s70_s25  }
  0x6d   : > { %p79_p10 = por %p77_p5, %p2230_p2  ;;  %s214_s5 = sand.u32 1, %s1729_s28  }
  0x6e   : > { %s216_s30 = sand.u32 1, %s1697_s20   ;;  %s1057_s11 = sshll.u32 %s1721_s26, 10 }
  0x6f   : > { %s1008_s12 = sshll.u32 %s216_s30, 6  ;;  %s1997_s0 = scalar_lea.hbm %s2181_s1, %s1057_s11 }
  0x70   : > { %s218_s24 = scalar_lea.vmem [#allocation6], %s1008_s12  ;;  %p2231_p7 = scmp.lt.s32.totalorder %s1729_s28, 4 }
  0x71   : > { %s225_s29 = sshll.u32 %s218_s24, 4  ;;  %s2007_s2 = scalar_lea.sflag [#allocation7], %s214_s5  ;;  %s2005_s29 = int_to_ptr.vmem [resolvable:$true] %s225_s29 }
  0x72   : > { %p2001_p11 = pnand %p2231_p7, %p79_p10  ;;  %s1545_s3 = scalar_lea.hbm %s1997_s0, 1024 }
  0x73   : > { %p1546_p0 = scmp.ne.s32.totalorder %s1997_s0, %s1545_s3  ;;  %s1550_s30 = scalar_lea.hbm %s2181_s1, 2048 }
  0x74   : > { %p1547_p13 = pneg %p2001_p11  ;;  %p1551_p8 = scmp.lt.u32.totalorder %s1997_s0, %s2181_s1 }
  0x75   : > { %p1552_p12 = scmp.lt.u32.totalorder %s1550_s30, %s1545_s3  ;;  %p1554_p3 = scmp.lt.u32.totalorder %s1545_s3, %s1997_s0 }
  0x76   : > { %p1548_p4 = pnand %p1547_p13, %p1546_p0 }
  0x77   : > { %p1553_p1 = por %p1552_p12, %p1551_p8 }
  0x78   : > { %p1549_p6 = pneg %p1548_p4 }
  0x79   : > { %p1555_p9 = por %p1554_p3, %p1553_p1 }
  0x7b   : > { %p1556_p5 = pnand %p1555_p9, %p1549_p6 }
  0x7d   : > { %1559 = shalt.err (!%p1556_p5)
}
  0x7e   : > { %s1560_s5 = scalar_lea.vmem %s2005_s29, 1024  ;;  %s1737_s9 = smov [#allocation6]  }
  0x7f   : > { %p1561_p2 = scmp.ne.s32.totalorder %s2005_s29, %s1560_s5  ;;  %s1565_s15 = sshll.u32 %s1737_s9, 4  ;;  %s1566_s15 = int_to_ptr.vmem [resolvable:$false] %s1565_s15 }
  0x80   : > { %s1567_s24 = scalar_lea.vmem %s1566_s15, 2048  ;;  %p1568_p0 = scmp.lt.s32.totalorder %s2005_s29, %s1566_s15 }
  0x81   : > { %p1563_p10 = pnand %p1561_p2, %p1547_p13  ;;  %p1569_p4 = scmp.lt.s32.totalorder %s1567_s24, %s1560_s5 }
  0x83   : > { %p1564_p7 = pneg %p1563_p10  ;;  %p1570_p8 = por %p1569_p4, %p1568_p0 }
  0x85   : > { %p1571_p12 = pnand %p1570_p8, %p1564_p7 }
  0x87   : > { %1574 = shalt.err (!%p1571_p12)
}
  0x88   : > { %1342 = dma.hbm_to_vmem [thread:$0]  (!%p2001_p11), %s1997_s0, 1024, %s2005_s29, %s2007_s2, %s1735_s14, %s1735_s14, %s1736_s8  }
  0x89   : > { %p2233_p13 = scmp.ne.s32.totalorder %s2221_s10, 0 }
  0x8a   : > { %s239_s3 = sand.u32 (!%p2233_p13), 1, %s1705_s22   ;;  %p2234_p6 = scmp.ne.s32.totalorder (!%p2233_p13), %s2214_s6, 0 }
  0x8b   : > { %237 = sbr.rel (%p2233_p13) target bundleno = 699 (0x2bb), region = 36  ;;  %s1012_s16 = sshll.u32 (!%p2233_p13), %s239_s3, 6 }
  0x8c   : > { %s240_s25 = scalar_lea.sflag (!%p2233_p13), [#allocation4], %s239_s3  ;;  %s2041_s30 = scalar_lea.vmem (!%p2233_p13), [#allocation3], %s1012_s16 }
  0x92   : > { %1660 = dma.done.wait (%p2234_p6), %s240_s25, 1024  }
  0x93   : > { %1662 = vsyncadd (%p2234_p6), %s240_s25, 4294966272  ;;  %s2235_s13 = sld [smem:[#allocation18_spill]]  ;;  %s2236_s12 = sld [smem:[#allocation19_spill]] }
  0x94   : > { %s250_s0 = sand.u32 1, %s1693_s19  }
  0x95   : > { %s1013_s14 = sshll.u32 %s250_s0, 6 }
  0x96   : > { %s2049_s8 = scalar_lea.vmem [#allocation6], %s1013_s14 }
  0x99   : > { %s248_s11 = sand.u32 1, %s2235_s13   ;;  %p2237_p11 = scmp.ne.s32.totalorder %s2236_s12, 0 }
  0x9a   : > { %s249_s10 = scalar_lea.sflag [#allocation7], %s248_s11 }
  0x9b   : > { %1664 = dma.done.wait (%p2237_p11), %s249_s10, 1024  }
  0x9c   : > { %1666 = vsyncadd (%p2237_p11), %s249_s10, 4294966272  ;;  %p2238_p1 = scmp.eq.s32.totalorder %s2235_s13, 0 }
  0x9e   : > { %1668 = dma.done.wait (%p2238_p1), [#allocation7], 2048   ;;  %p2239_p3 = pmov %p2238_p1 }
  0x9f   : > { %s2240_s6 = sld [smem:[#allocation15_spill]]  ;;  %s2241_s9 = sld [smem:[#allocation16_spill]] }
  0xa0   : > { %1670 = vsyncadd (%p2239_p3), [#allocation7], 4294965248 }
  0xa5   : > { %s283_s29 = sand.u32 1, %s2240_s6   ;;  %p1016_p9 = scmp.ne.s32.totalorder %s2241_s9, 0 }
  0xa6   : > { %s1015_s2 = sshll.u32 %s283_s29, 6  ;;  %v1738_v0 = vmov (!%p1016_p9), 0.0  }
  0xa7   : > { %s2062_s5 = scalar_lea.vmem [#allocation9], %s1015_s2  ;;  %293 = sbr.rel (%p1016_p9) target bundleno = 175 (0xaf), region = 52  ;;  %294 = vst [vmem:[#allocation2] sm:$0xff] (!%p1016_p9), %v1738_v0  ;;  %295 = vst [vmem:[#allocation2 + $0x8] sm:$0xff] (!%p1016_p9), %v1738_v0 }
  0xa8   : > { %296 = vst [vmem:[#allocation2 + $0x10] sm:$0xff] (!%p1016_p9), %v1738_v0  ;;  %297 = vst [vmem:[#allocation2 + $0x18] sm:$0xff] (!%p1016_p9), %v1738_v0 }
  0xa9   : > { %298 = vst [vmem:[#allocation2 + $0x20] sm:$0xff] (!%p1016_p9), %v1738_v0  ;;  %299 = vst [vmem:[#allocation2 + $0x28] sm:$0xff] (!%p1016_p9), %v1738_v0 }
  0xaa   : > { %300 = vst [vmem:[#allocation2 + $0x30] sm:$0xff] (!%p1016_p9), %v1738_v0  ;;  %301 = vst [vmem:[#allocation2 + $0x38] sm:$0xff] (!%p1016_p9), %v1738_v0 }
  0xab   : > { %302 = vst [vmem:[#allocation2 + $0x40] sm:$0xff] (!%p1016_p9), %v1738_v0  ;;  %303 = vst [vmem:[#allocation2 + $0x48] sm:$0xff] (!%p1016_p9), %v1738_v0 }
  0xac   : > { %304 = vst [vmem:[#allocation2 + $0x50] sm:$0xff] (!%p1016_p9), %v1738_v0  ;;  %305 = vst [vmem:[#allocation2 + $0x58] sm:$0xff] (!%p1016_p9), %v1738_v0 }
  0xad   : > { %306 = vst [vmem:[#allocation2 + $0x60] sm:$0xff] (!%p1016_p9), %v1738_v0  ;;  %307 = vst [vmem:[#allocation2 + $0x68] sm:$0xff] (!%p1016_p9), %v1738_v0 }
  0xae   : > { %308 = vst [vmem:[#allocation2 + $0x70] sm:$0xff] %v1738_v0  ;;  %309 = vst [vmem:[#allocation2 + $0x78] sm:$0xff] %v1738_v0 }
  0xaf PF: > { %v1471_v1 = vld [vmem:[%s2049_s8] sm:$0xff]   ;;  %v1472_v2 = vld [vmem:[%s2049_s8 + $0x8] sm:$0xff]   ;;  %v1473_v3 = vld [vmem:[%s2049_s8 + $0x10] sm:$0xff]   ;;  %s2242_s15 = sld [smem:[#allocation16_spill]] }
  0xb0   : > { %1170 = vmatprep.subr.bf16.mxu0 %v1471_v1  ;;  %1290 = vmatprep.subr.bf16.mxu1 %v1471_v1  ;;  %v1474_v4 = vld [vmem:[%s2049_s8 + $0x18] sm:$0xff]   ;;  %v1479_v5 = vld [vmem:[%s2041_s30] sm:$0xff]   ;;  %v1476_v8 = vld [vmem:[%s2049_s8 + $0x28] sm:$0xff]  }
  0xb1   : > { %1171 = vmatpush3.bf16.msra.mxu0 %v1471_v1  ;;  %1298 = vmatpush3.bf16.msra.mxu1 %v1471_v1  ;;  %v1480_v6 = vld [vmem:[%s2041_s30 + $0x20] sm:$0xff]   ;;  %v1477_v9 = vld [vmem:[%s2049_s8 + $0x30] sm:$0xff]   ;;  %v1478_v10 = vld [vmem:[%s2049_s8 + $0x38] sm:$0xff]  }
  0xb2   : > { %1172 = vmatprep.subr.bf16.mxu0 %v1472_v2  ;;  %1291 = vmatprep.subr.bf16.mxu1 %v1472_v2  ;;  %v1475_v7 = vld [vmem:[%s2049_s8 + $0x20] sm:$0xff]   ;;  %v1481_v11 = vld [vmem:[%s2041_s30 + $0x8] sm:$0xff]   ;;  %v1483_v13 = vld [vmem:[%s2041_s30 + $0x10] sm:$0xff]  }
  0xb3   : > { %1186 = vmatprep.mubr.bf16.mxu0 %v1479_v5  ;;  %1194 = vmatprep.mubr.bf16.mxu1 %v1480_v6  ;;  %v1482_v12 = vld [vmem:[%s2041_s30 + $0x28] sm:$0xff]   ;;  %v1484_v14 = vld [vmem:[%s2041_s30 + $0x30] sm:$0xff]   ;;  %v1485_v15 = vld [vmem:[%s2041_s30 + $0x18] sm:$0xff]  }
  0xb4   : > { %v1486_v16 = vld [vmem:[%s2041_s30 + $0x38] sm:$0xff]   ;;  %v312_v17 = vld [vmem:[#allocation2 + $0x10] sm:$0xff]  ;;  %v310_v19 = vld [vmem:[#allocation2] sm:$0xff] }
  0xb5   : > { %1173 = vmatpush3.bf16.msra.mxu0 %v1472_v2  ;;  %1299 = vmatpush3.bf16.msra.mxu1 %v1472_v2  ;;  %v320_v18 = vld [vmem:[#allocation2 + $0x50] sm:$0xff]  ;;  %v318_v20 = vld [vmem:[#allocation2 + $0x40] sm:$0xff]  ;;  %v313_v23 = vld [vmem:[#allocation2 + $0x18] sm:$0xff]  ;;  %p1033_p5 = scmp.ne.s32.totalorder %s2242_s15, 1 }
  0xb6   : > { %1174 = vmatprep.subr.bf16.mxu0 %v1473_v3  ;;  %1292 = vmatprep.subr.bf16.mxu1 %v1473_v3  ;;  %v321_v24 = vld [vmem:[#allocation2 + $0x58] sm:$0xff]  ;;  %v311_v29 = vld [vmem:[#allocation2 + $0x8] sm:$0xff]  ;;  %v316_v41 = vld [vmem:[#allocation2 + $0x30] sm:$0xff]  ;;  %s2243_s16 = sld [smem:[#allocation25_spill]] (!%p1033_p5) }
  0xb7   : > { %v319_v30 = vld [vmem:[#allocation2 + $0x48] sm:$0xff]  ;;  %v324_v42 = vld [vmem:[#allocation2 + $0x70] sm:$0xff]  ;;  %v314_v43 = vld [vmem:[#allocation2 + $0x20] sm:$0xff] }
  0xb8   : > { %v322_v44 = vld [vmem:[#allocation2 + $0x60] sm:$0xff]  ;;  %v317_v47 = vld [vmem:[#allocation2 + $0x38] sm:$0xff]  ;;  %v315_v53 = vld [vmem:[#allocation2 + $0x28] sm:$0xff] }
  0xb9   : > { %1175 = vmatpush3.bf16.msra.mxu0 %v1473_v3  ;;  %1300 = vmatpush3.bf16.msra.mxu1 %v1473_v3  ;;  %v325_v48 = vld [vmem:[#allocation2 + $0x78] sm:$0xff]  ;;  %v323_v54 = vld [vmem:[#allocation2 + $0x68] sm:$0xff]  ;;  %v603_v1 = vld [vmem:[#allocation8] sm:$0xff] (!%p1033_p5) }
  0xba   : > { %1176 = vmatprep.subr.bf16.mxu0 %v1474_v4  ;;  %1293 = vmatprep.subr.bf16.mxu1 %v1474_v4  ;;  %v604_v2 = vld [vmem:[#allocation8 + $0x8] sm:$0xff] (!%p1033_p5)  ;;  %v605_v3 = vld [vmem:[#allocation8 + $0x10] sm:$0xff] (!%p1033_p5)  ;;  %v606_v5 = vld [vmem:[#allocation8 + $0x18] sm:$0xff] (!%p1033_p5) }
  0xbb   : > { %v1262_v6 = vpack.c.bf16 (!%p1033_p5), %v606_v5, %v605_v3 }
  0xbd   : > { %1177 = vmatpush3.bf16.msra.mxu0 %v1474_v4  ;;  %1301 = vmatpush3.bf16.msra.mxu1 %v1474_v4  ;;  %v1258_v4 = vpack.c.bf16 (!%p1033_p5), %v604_v2, %v603_v1 }
  0xbe   : > { %1178 = vmatprep.subr.bf16.mxu0 %v1475_v7  ;;  %1294 = vmatprep.subr.bf16.mxu1 %v1475_v7 }
  0xc1   : > { %1179 = vmatpush3.bf16.msra.mxu0 %v1475_v7  ;;  %1302 = vmatpush3.bf16.msra.mxu1 %v1475_v7  ;;  %v607_v7 = vld [vmem:[#allocation8 + $0x20] sm:$0xff] (!%p1033_p5) }
  0xc2   : > { %1180 = vmatprep.subr.bf16.mxu0 %v1476_v8  ;;  %1295 = vmatprep.subr.bf16.mxu1 %v1476_v8 }
  0xc5   : > { %1181 = vmatpush3.bf16.msra.mxu0 %v1476_v8  ;;  %1303 = vmatpush3.bf16.msra.mxu1 %v1476_v8  ;;  %v608_v8 = vld [vmem:[#allocation8 + $0x28] sm:$0xff] (!%p1033_p5) }
  0xc6   : > { %1182 = vmatprep.subr.bf16.mxu0 %v1477_v9  ;;  %1296 = vmatprep.subr.bf16.mxu1 %v1477_v9 }
  0xc9   : > { %1183 = vmatpush3.bf16.msra.mxu0 %v1477_v9  ;;  %1304 = vmatpush3.bf16.msra.mxu1 %v1477_v9  ;;  %v1266_v9 = vpack.c.bf16 (!%p1033_p5), %v608_v8, %v607_v7 }
  0xca   : > { %1184 = vmatprep.subr.bf16.mxu0 %v1478_v10  ;;  %1297 = vmatprep.subr.bf16.mxu1 %v1478_v10 }
  0xcd   : > { %1185 = vmatpush3.bf16.msra.mxu0 %v1478_v10  ;;  %1305 = vmatpush3.bf16.msra.mxu1 %v1478_v10 }
  0xce   : > { %1259 = vmatprep.subr.bf16.mxu0 (!%p1033_p5), %v1258_v4  ;;  %1306 = vmatprep.subr.bf16.mxu1 (!%p1033_p5), %v1258_v4 }
  0xd0   : > { %1187 = vmatmul.mubr.bf16.vlgmr.msra.gmra.mrb[0].mxu0 %v1481_v11  ;;  %1195 = vmatmul.mubr.bf16.vlgmr.msra.gmra.mrb[0].mxu1 %v1482_v12  ;;  %v609_v12 = vld [vmem:[#allocation8 + $0x30] sm:$0xff] (!%p1033_p5) }
  0xd1   : > { %1190 = vmatprep.mubr.bf16.mxu0 %v1483_v13  ;;  %1198 = vmatprep.mubr.bf16.mxu1 %v1484_v14  ;;  %v610_v13 = vld [vmem:[#allocation8 + $0x38] sm:$0xff] (!%p1033_p5) }
  0xd2   : > { %1261 = vmatpush3.bf16.msra.mxu0 (!%p1033_p5), %v1258_v4  ;;  %1314 = vmatpush3.bf16.msra.mxu1 (!%p1033_p5), %v1258_v4  ;;  %v1270_v14 = vpack.c.bf16 (!%p1033_p5), %v610_v13, %v609_v12 }
  0xd3   : > { %1263 = vmatprep.subr.bf16.mxu0 (!%p1033_p5), %v1262_v6  ;;  %1307 = vmatprep.subr.bf16.mxu1 (!%p1033_p5), %v1262_v6 }
  0xd6   : > { %1265 = vmatpush3.bf16.msra.mxu0 (!%p1033_p5), %v1262_v6  ;;  %1315 = vmatpush3.bf16.msra.mxu1 (!%p1033_p5), %v1262_v6 }
  0xd7   : > { %1267 = vmatprep.subr.bf16.mxu0 (!%p1033_p5), %v1266_v9  ;;  %1308 = vmatprep.subr.bf16.mxu1 (!%p1033_p5), %v1266_v9 }
  0xd8   : > { %1191 = vmatmul.mubr.bf16.gmra.mrb[4].mxu0 %v1485_v15  ;;  %1199 = vmatmul.mubr.bf16.gmra.mrb[4].mxu1 %v1486_v16  ;;  %v611_v15 = vld [vmem:[#allocation8 + $0x40] sm:$0xff] (!%p1033_p5)  ;;  %v612_v16 = vld [vmem:[#allocation8 + $0x48] sm:$0xff] (!%p1033_p5) }
  0xda   : > { %1269 = vmatpush3.bf16.msra.mxu0 (!%p1033_p5), %v1266_v9  ;;  %1316 = vmatpush3.bf16.msra.mxu1 (!%p1033_p5), %v1266_v9 }
  0xdb   : > { %1271 = vmatprep.subr.bf16.mxu0 (!%p1033_p5), %v1270_v14  ;;  %1309 = vmatprep.subr.bf16.mxu1 (!%p1033_p5), %v1270_v14 }
  0xde   : > { %1273 = vmatpush3.bf16.msra.mxu0 (!%p1033_p5), %v1270_v14  ;;  %1317 = vmatpush3.bf16.msra.mxu1 (!%p1033_p5), %v1270_v14 }
 0x1a3   : > { %v1188_v21 = vpop.f32.mrb[0].mxu0  ;;  %v1196_v22 = vpop.f32.mrb[0].mxu1 }
 0x1a4   : > { %v553_v25 = vadd.f32 %v1188_v21, %v312_v17  ;;  %v561_v26 = vadd.f32 %v1196_v22, %v320_v18  ;;  %v488_v27 = vpop.f32.mrb[1].mxu0  ;;  %v520_v28 = vpop.f32.mrb[1].mxu1  ;;  %v1274_v17 = vpack.c.bf16 (!%p1033_p5), %v612_v16, %v611_v15  ;;  %v613_v18 = vld [vmem:[#allocation8 + $0x50] sm:$0xff] (!%p1033_p5)  ;;  %v615_v21 = vld [vmem:[#allocation8 + $0x60] sm:$0xff] (!%p1033_p5)  ;;  %v616_v22 = vld [vmem:[#allocation8 + $0x68] sm:$0xff] (!%p1033_p5) }
 0x1a5   : > { %v551_v31 = vadd.f32 %v488_v27, %v310_v19  ;;  %v559_v32 = vadd.f32 %v520_v28, %v318_v20  ;;  %v1189_v33 = vpop.f32.mrb[2].mxu0  ;;  %v1197_v34 = vpop.f32.mrb[2].mxu1  ;;  %v614_v19 = vld [vmem:[#allocation8 + $0x58] sm:$0xff] (!%p1033_p5) }
 0x1a6   : > { %569 = vst [vmem:[#allocation2 + $0x10] sm:$0xff] %v553_v25  ;;  %577 = vst [vmem:[#allocation2 + $0x50] sm:$0xff] %v561_v26  ;;  %v554_v35 = vadd.f32 %v1189_v33, %v313_v23  ;;  %v562_v36 = vadd.f32 %v1197_v34, %v321_v24  ;;  %v491_v37 = vpop.f32.mrb[3].mxu0  ;;  %v523_v38 = vpop.f32.mrb[3].mxu1  ;;  %1275 = vmatprep.subr.bf16.mxu0 (!%p1033_p5), %v1274_v17  ;;  %1310 = vmatprep.subr.bf16.mxu1 (!%p1033_p5), %v1274_v17  ;;  %v617_v24 = vld [vmem:[#allocation8 + $0x70] sm:$0xff] (!%p1033_p5)  ;;  %v618_v25 = vld [vmem:[#allocation8 + $0x78] sm:$0xff] (!%p1033_p5) }
 0x1a7   : > { %567 = vst [vmem:[#allocation2] sm:$0xff] %v551_v31  ;;  %575 = vst [vmem:[#allocation2 + $0x40] sm:$0xff] %v559_v32  ;;  %v552_v39 = vadd.f32 %v491_v37, %v311_v29  ;;  %v560_v40 = vadd.f32 %v523_v38, %v319_v30  ;;  %v1278_v20 = vpack.c.bf16 (!%p1033_p5), %v614_v19, %v613_v18  ;;  %1277 = vmatpush3.bf16.msra.mxu0 (!%p1033_p5), %v1274_v17 }
 0x1a8   : > { %570 = vst [vmem:[#allocation2 + $0x18] sm:$0xff] %v554_v35  ;;  %578 = vst [vmem:[#allocation2 + $0x58] sm:$0xff] %v562_v36  ;;  %1318 = vmatpush3.bf16.msra.mxu1 (!%p1033_p5), %v1274_v17  ;;  %v1282_v23 = vpack.c.bf16 (!%p1033_p5), %v616_v22, %v615_v21  ;;  %v1286_v26 = vpack.c.bf16 (!%p1033_p5), %v618_v25, %v617_v24 }
 0x1a9   : > { %568 = vst [vmem:[#allocation2 + $0x8] sm:$0xff] %v552_v39  ;;  %576 = vst [vmem:[#allocation2 + $0x48] sm:$0xff] %v560_v40  ;;  %1279 = vmatprep.subr.bf16.mxu0 (!%p1033_p5), %v1278_v20  ;;  %1311 = vmatprep.subr.bf16.mxu1 (!%p1033_p5), %v1278_v20 }
 0x1ab   : > { %v1192_v45 = vpop.f32.mrb[4].mxu0  ;;  %v1200_v46 = vpop.f32.mrb[4].mxu1  ;;  %586 = sbr.rel (%p1033_p5) target bundleno = 671 (0x29f), region = 56  ;;  %1281 = vmatpush3.bf16.msra.mxu0 (!%p1033_p5), %v1278_v20 }
 0x1ac   : > { %v557_v49 = vadd.f32 %v1192_v45, %v316_v41  ;;  %v565_v50 = vadd.f32 %v1200_v46, %v324_v42  ;;  %v504_v51 = vpop.f32.mrb[5].mxu0  ;;  %v536_v52 = vpop.f32.mrb[5].mxu1  ;;  %1319 = vmatpush3.bf16.msra.mxu1 (!%p1033_p5), %v1278_v20  ;;  %1283 = vmatprep.subr.bf16.mxu0 (!%p1033_p5), %v1282_v23  ;;  %v1034_v41 = vld [vmem:[%s2243_s16] ss:$0 sm:$0xff] (!%p1033_p5) }
 0x1ad   : > { %v555_v55 = vadd.f32 %v504_v51, %v314_v43  ;;  %v563_v56 = vadd.f32 %v536_v52, %v322_v44  ;;  %v1193_v57 = vpop.f32.mrb[6].mxu0  ;;  %v1201_v58 = vpop.f32.mrb[6].mxu1  ;;  %1312 = vmatprep.subr.bf16.mxu1 (!%p1033_p5), %v1282_v23  ;;  %v589_v29 = vld [vmem:[#allocation2 + $0x10] sm:$0xff] (!%p1033_p5) }
 0x1ae   : > { %573 = vst [vmem:[#allocation2 + $0x30] sm:$0xff] %v557_v49  ;;  %581 = vst [vmem:[#allocation2 + $0x70] sm:$0xff] %v565_v50  ;;  %v558_v59 = vadd.f32 %v1193_v57, %v317_v47  ;;  %v566_v60 = vadd.f32 %v1201_v58, %v325_v48  ;;  %v507_v61 = vpop.f32.mrb[7].mxu0  ;;  %v539_v62 = vpop.f32.mrb[7].mxu1  ;;  %v587_v10 = vld [vmem:[#allocation2] sm:$0xff] (!%p1033_p5)  ;;  %v597_v30 = vld [vmem:[#allocation2 + $0x50] sm:$0xff] (!%p1033_p5) }
 0x1af   : > { %571 = vst [vmem:[#allocation2 + $0x20] sm:$0xff] %v555_v55  ;;  %579 = vst [vmem:[#allocation2 + $0x60] sm:$0xff] %v563_v56  ;;  %v556_v63 = vadd.f32 %v507_v61, %v315_v53  ;;  %v564_v0 = vadd.f32 %v539_v62, %v323_v54  ;;  %v595_v11 = vld [vmem:[#allocation2 + $0x40] sm:$0xff] (!%p1033_p5)  ;;  %1234 = vmatprep.mubr.f32.mxu0 (!%p1033_p5), %v587_v10  ;;  %1285 = vmatpush3.bf16.msra.mxu0 (!%p1033_p5), %v1282_v23  ;;  %v590_v31 = vld [vmem:[#allocation2 + $0x18] sm:$0xff] (!%p1033_p5) }
 0x1b0   : > { %574 = vst [vmem:[#allocation2 + $0x38] sm:$0xff] %v558_v59  ;;  %582 = vst [vmem:[#allocation2 + $0x78] sm:$0xff] %v566_v60  ;;  %1246 = vmatprep.mubr.f32.mxu1 (!%p1033_p5), %v595_v11  ;;  %1320 = vmatpush3.bf16.msra.mxu1 (!%p1033_p5), %v1282_v23  ;;  %v588_v27 = vld [vmem:[#allocation2 + $0x8] sm:$0xff] (!%p1033_p5)  ;;  %v598_v32 = vld [vmem:[#allocation2 + $0x58] sm:$0xff] (!%p1033_p5) }
 0x1b1   : > { %572 = vst [vmem:[#allocation2 + $0x28] sm:$0xff] %v556_v63  ;;  %580 = vst [vmem:[#allocation2 + $0x68] sm:$0xff] %v564_v0  ;;  %1287 = vmatprep.subr.bf16.mxu0 (!%p1033_p5), %v1286_v26  ;;  %1313 = vmatprep.subr.bf16.mxu1 (!%p1033_p5), %v1286_v26  ;;  %v596_v28 = vld [vmem:[#allocation2 + $0x48] sm:$0xff] (!%p1033_p5) }
 0x1b3   : > { %1289 = vmatpush3.bf16.msra.mxu0 %v1286_v26 }
 0x1b4   : > { %1321 = vmatpush3.bf16.msra.mxu1 %v1286_v26 }
 0x1b5   : > { %v593_v37 = vld [vmem:[#allocation2 + $0x30] sm:$0xff] }
 0x1b6   : > { %1235 = vmatmul.mubr.f32.vlgmr.msra.gmra.mrb[0].mxu0 %v588_v27  ;;  %v591_v33 = vld [vmem:[#allocation2 + $0x20] sm:$0xff]  ;;  %v601_v38 = vld [vmem:[#allocation2 + $0x70] sm:$0xff] }
 0x1b7   : > { %1247 = vmatmul.mubr.f32.vlgmr.msra.gmra.mrb[0].mxu1 %v596_v28  ;;  %1237 = vmatprep.mubr.f32.mxu0 %v589_v29  ;;  %v599_v34 = vld [vmem:[#allocation2 + $0x60] sm:$0xff]  ;;  %v594_v39 = vld [vmem:[#allocation2 + $0x38] sm:$0xff] }
 0x1b8   : > { %1249 = vmatprep.mubr.f32.mxu1 %v597_v30  ;;  %v592_v35 = vld [vmem:[#allocation2 + $0x28] sm:$0xff]  ;;  %v602_v40 = vld [vmem:[#allocation2 + $0x78] sm:$0xff] }
 0x1b9   : > { %v600_v36 = vld [vmem:[#allocation2 + $0x68] sm:$0xff] }
 0x1ba   : > { %1238 = vmatmul.mubr.f32.gmra.mrb[2].mxu0 %v590_v31 }
 0x1bb   : > { %1250 = vmatmul.mubr.f32.gmra.mrb[2].mxu1 %v598_v32  ;;  %1240 = vmatprep.mubr.f32.mxu0 %v591_v33 }
 0x1bc   : > { %1252 = vmatprep.mubr.f32.mxu1 %v599_v34 }
 0x1be   : > { %1241 = vmatmul.mubr.f32.gmra.mrb[4].mxu0 %v592_v35 }
 0x1bf   : > { %1253 = vmatmul.mubr.f32.gmra.mrb[4].mxu1 %v600_v36  ;;  %1243 = vmatprep.mubr.f32.mxu0 %v593_v37 }
 0x1c0   : > { %1255 = vmatprep.mubr.f32.mxu1 %v601_v38 }
 0x1c2   : > { %1244 = vmatmul.mubr.f32.gmra.mrb[6].mxu0 %v594_v39 }
 0x1c3   : > { %1256 = vmatmul.mubr.f32.gmra.mrb[6].mxu1 %v602_v40 }
 0x289   : > { %v1236_v42 = vpop.f32.mrb[0].mxu0 }
 0x28a   : > { %v1248_v43 = vpop.f32.mrb[0].mxu1  ;;  %v698_v44 = vadd.f32 %v1236_v42, %v1034_v41  ;;  %v692_v46 = vpop.f32.mrb[1].mxu0 }
 0x28b   : > { %v738_v45 = vadd.f32 %v1248_v43, %v1034_v41  ;;  %v732_v47 = vpop.f32.mrb[1].mxu1  ;;  %v693_v48 = vadd.f32 %v1034_v41, %v692_v46 }
 0x28c   : > { %v733_v49 = vadd.f32 %v1034_v41, %v732_v47  ;;  %v772_v50 = vmax.f32 %v698_v44, 0.0 }
 0x28d   : > { %v780_v51 = vmax.f32 %v738_v45, 0.0  ;;  %v771_v52 = vmax.f32 %v693_v48, 0.0  ;;  %v1239_v54 = vpop.f32.mrb[2].mxu0 }
 0x28e   : > { %v779_v53 = vmax.f32 %v733_v49, 0.0  ;;  %v1251_v55 = vpop.f32.mrb[2].mxu1  ;;  %v708_v56 = vadd.f32 %v1239_v54, %v1034_v41  ;;  %v702_v58 = vpop.f32.mrb[3].mxu0 }
 0x28f   : > { %v748_v57 = vadd.f32 %v1251_v55, %v1034_v41  ;;  %v742_v59 = vpop.f32.mrb[3].mxu1  ;;  %v1078_v60 = vpack.c.bf16 %v772_v50, %v771_v52  ;;  %v703_v62 = vadd.f32 %v1034_v41, %v702_v58 }
 0x290   : > { %v1098_v61 = vpack.c.bf16 %v780_v51, %v779_v53  ;;  %v743_v63 = vadd.f32 %v1034_v41, %v742_v59  ;;  %v774_v0 = vmax.f32 %v708_v56, 0.0 }
 0x291   : > { %v782_v1 = vmax.f32 %v748_v57, 0.0  ;;  %1079 = vst [vmem:[%s2062_s5] sm:$0xff] %v1078_v60   ;;  %v773_v2 = vmax.f32 %v703_v62, 0.0  ;;  %v1242_v4 = vpop.f32.mrb[4].mxu0 }
 0x292   : > { %1118 = vst [vmem:[%s2062_s5 + $0x20] sm:$0xff] %v1098_v61   ;;  %v781_v3 = vmax.f32 %v743_v63, 0.0  ;;  %v1254_v5 = vpop.f32.mrb[4].mxu1  ;;  %v718_v6 = vadd.f32 %v1242_v4, %v1034_v41  ;;  %v712_v8 = vpop.f32.mrb[5].mxu0 }
 0x293   : > { %v758_v7 = vadd.f32 %v1254_v5, %v1034_v41  ;;  %v752_v9 = vpop.f32.mrb[5].mxu1  ;;  %v1083_v10 = vpack.c.bf16 %v774_v0, %v773_v2  ;;  %v713_v12 = vadd.f32 %v1034_v41, %v712_v8 }
 0x294   : > { %v1103_v11 = vpack.c.bf16 %v782_v1, %v781_v3  ;;  %v753_v13 = vadd.f32 %v1034_v41, %v752_v9  ;;  %v776_v14 = vmax.f32 %v718_v6, 0.0 }
 0x295   : > { %v784_v15 = vmax.f32 %v758_v7, 0.0  ;;  %1115 = vst [vmem:[%s2062_s5 + $0x8] sm:$0xff] %v1083_v10   ;;  %v775_v16 = vmax.f32 %v713_v12, 0.0  ;;  %v1245_v18 = vpop.f32.mrb[6].mxu0 }
 0x296   : > { %1119 = vst [vmem:[%s2062_s5 + $0x28] sm:$0xff] %v1103_v11   ;;  %v783_v17 = vmax.f32 %v753_v13, 0.0  ;;  %v1257_v19 = vpop.f32.mrb[6].mxu1  ;;  %v728_v20 = vadd.f32 %v1245_v18, %v1034_v41  ;;  %v722_v22 = vpop.f32.mrb[7].mxu0 }
 0x297   : > { %v768_v21 = vadd.f32 %v1257_v19, %v1034_v41  ;;  %v762_v23 = vpop.f32.mrb[7].mxu1  ;;  %v1088_v24 = vpack.c.bf16 %v776_v14, %v775_v16  ;;  %v723_v26 = vadd.f32 %v1034_v41, %v722_v22 }
 0x298   : > { %v1108_v25 = vpack.c.bf16 %v784_v15, %v783_v17  ;;  %v763_v27 = vadd.f32 %v1034_v41, %v762_v23  ;;  %v778_v28 = vmax.f32 %v728_v20, 0.0 }
 0x299   : > { %v786_v29 = vmax.f32 %v768_v21, 0.0  ;;  %1116 = vst [vmem:[%s2062_s5 + $0x10] sm:$0xff] %v1088_v24   ;;  %v777_v30 = vmax.f32 %v723_v26, 0.0 }
 0x29a   : > { %1120 = vst [vmem:[%s2062_s5 + $0x30] sm:$0xff] %v1108_v25   ;;  %v785_v31 = vmax.f32 %v763_v27, 0.0 }
 0x29b   : > { %v1093_v32 = vpack.c.bf16 %v778_v28, %v777_v30 }
 0x29c   : > { %v1113_v33 = vpack.c.bf16 %v786_v29, %v785_v31 }
 0x29d   : > { %1117 = vst [vmem:[%s2062_s5 + $0x18] sm:$0xff] %v1093_v32  }
 0x29e   : > { %1121 = vst [vmem:[%s2062_s5 + $0x38] sm:$0xff] %v1113_v33  }
 0x29f PF: > { %s2244_s25 = sld [smem:[#allocation17_spill]]  ;;  %s2246_s13 = sld [smem:[#allocation20_spill]] }
 0x2a0   : > { %s2247_s14 = sld [smem:[#allocation26_spill]]  ;;  %s881_s8 = sshll.u32 %s2062_s5, 4  ;;  %s2100_s8 = int_to_ptr.vmem [resolvable:$true] %s881_s8 }
 0x2a1   : > { %s2104_s6 = scalar_lea.sflag [#allocation5], %s283_s29  ;;  %s1575_s2 = scalar_lea.vmem %s2100_s8, 1024 }
 0x2a2   : > { %p1576_p2 = scmp.ne.s32.totalorder %s2100_s8, %s1575_s2  ;;  %s1739_s9 = smov [#allocation9]  }
 0x2a3   : > { %s1579_s15 = sshll.u32 %s1739_s9, 4  ;;  %s1580_s15 = int_to_ptr.vmem [resolvable:$false] %s1579_s15 }
 0x2a4   : > { %s1581_s24 = scalar_lea.vmem %s1580_s15, 2048  ;;  %p1582_p4 = scmp.lt.s32.totalorder %s2100_s8, %s1580_s15 }
 0x2a5   : > { %s1074_s12 = sshll.u32 %s2244_s25, 10  ;;  %p2248_p10 = scmp.ne.s32.totalorder %s2246_s13, 0 }
 0x2a6   : > { %s2097_s10 = scalar_lea.hbm %s2247_s14, %s1074_s12  ;;  %p1583_p8 = scmp.lt.s32.totalorder %s1581_s24, %s1575_s2 }
 0x2a7   : > { %p1577_p7 = pnand %p1576_p2, %p2248_p10 }
 0x2a8   : > { %p1584_p12 = por %p1583_p8, %p1582_p4 }
 0x2a9   : > { %p1578_p0 = pneg %p1577_p7 }
 0x2ab   : > { %p1585_p13 = pnand %p1584_p12, %p1578_p0 }
 0x2ad   : > { %1588 = shalt.err (!%p1585_p13)
}
 0x2ae   : > { %s1589_s29 = scalar_lea.hbm %s2097_s10, 1024  ;;  %s1593_s16 = scalar_lea.hbm %s2247_s14, 2048 }
 0x2af   : > { %p1590_p6 = scmp.ne.s32.totalorder %s2097_s10, %s1589_s29  ;;  %p1594_p3 = scmp.lt.u32.totalorder %s2097_s10, %s2247_s14 }
 0x2b0   : > { %p1595_p9 = scmp.lt.u32.totalorder %s1593_s16, %s1589_s29  ;;  %p1597_p2 = scmp.lt.u32.totalorder %s1589_s29, %s2097_s10 }
 0x2b1   : > { %p1591_p11 = pnand %p1590_p6, %p2248_p10 }
 0x2b2   : > { %p1596_p5 = por %p1595_p9, %p1594_p3 }
 0x2b3   : > { %p1592_p1 = pneg %p1591_p11 }
 0x2b4   : > { %p1598_p7 = por %p1597_p2, %p1596_p5 }
 0x2b6   : > { %p1599_p0 = pnand %p1598_p7, %p1592_p1 }
 0x2b8   : > { %1602 = shalt.err (!%p1599_p0)
}
 0x2b9   : > { %s1740_s12 = smov 64   ;;  %s1741_s11 = smov 4  }
 0x2ba   : > { %1330 = dma.vmem_to_hbm [thread:$0]  (%p2248_p10), %s2100_s8, 1024, %s2097_s10, %s2104_s6, %s1740_s12, %s1740_s12, %s1741_s11  }
 0x2bb PF: > { %s2249_s0 = sld [smem:[#allocation14_spill]]  ;;  %s2250_s2 = sld [smem:[#allocation21_spill]] }
 0x2bc   : > { %p1350_p4 = scmp.ge.s32.totalorder %s1729_s28, 2 }
 0x2c1   : > { %s896_s9 = sand.u32 1, %s2249_s0   ;;  %p2251_p8 = scmp.ne.s32.totalorder %s2250_s2, 0 }
 0x2c2   : > { %s897_s15 = scalar_lea.sflag [#allocation5], %s896_s9 }
 0x2c3   : > { %p1344_p12 = pnand %p1350_p4, %p2251_p8 }
 0x2c5   : > { %1672 = dma.done.wait (!%p1344_p12), %s897_s15, 1024  }
 0x2c6   : > { %1674 = vsyncadd (!%p1344_p12), %s897_s15, 4294966272  ;;  %s23_s28 = sadd.s32 1, %s1729_s28   ;;  %s2253_s15 = sld [smem:[#allocation15_spill]] }
 0x2c7   : > { %p2133_p13 = scmp.ge.s32.totalorder %s23_s28, 6   ;;  %s2254_s13 = sld [smem:[#allocation22_spill]] }
 0x2c8   : > { %s2255_s10 = smov %s2274_s21  ;;  %s2257_s16 = smov %s1685_s17 }
 0x2c9   : > { %s2258_s17 = smov %s1929_s18  ;;  %s2259_s18 = smov %s1693_s19 }
 0x2ca   : > { %s2260_s19 = smov %s1697_s20  ;;  %s2261_s20 = smov %s1987_s7 }
 0x2cb   : > { %s2262_s21 = smov %s1705_s22  ;;  %s2263_s22 = smov %s1709_s23 }
 0x2cc   : > { %s2264_s23 = smov %s1932_s4  ;;  %s2265_s24 = smov %s1721_s26 }
 0x2cd   : > { %s2266_s25 = smov %s1725_s27  ;;  %s2267_s26 = smov %s2254_s13 }
 0x2ce   : > { %s2268_s27 = smov %s2255_s10  ;;  %22 = sbr.rel (!%p2133_p13) target bundleno = 17 (0x11), region = 106 }
 0x2d5   :  { %902 = vsyncpa [#allocation4], 1 }
 0x2d6   :  { %904 = vsyncpa [#allocation4 + $0x1], 1 }
 0x2d7   :  { %905 = vsyncpa [#allocation7], 1 }
 0x2d8   :  { %907 = vsyncpa [#allocation7 + $0x1], 1 }
 0x2d9   :  { %908 = vsyncpa [#allocation5], 1 }
 0x2da   :  { %910 = vsyncpa [#allocation5 + $0x1], 1 }

</bundles_post_ra>
